<compile_context>
chip_gen: v7x
topology: tpu7x:2x2x1
jax: 0.10.0
libtpu: 0.0.40
codegen_flags: <defaults>
</compile_context>

<pallas_src>
import functools

import jax
import jax.numpy as jnp
from jax.experimental import pallas as pl
from jax.experimental.pallas import tpu as pltpu


def _cross_match_kernel(x_ref, pos_ref, neg_ref, psem_ref, nsem_ref,
                        pos_out, neg_out, loss_out, *, alpha):
    alpha_f = jnp.float32(alpha)
    one_minus_alpha = jnp.float32(1.0 - alpha)

    x = x_ref[...].astype(jnp.float32)                 # (tb, D)
    x_sq = jnp.sum(x * x, axis=-1, keepdims=True)      # (tb, 1)
    xb = x[:, None, :]                                 # (tb, 1, D)

    # ---- positive path (kept separate from negative path so only one
    #      (tb, P, D) set of temporaries is live at a time) ----
    pos = pos_ref[...].astype(jnp.float32)             # (tb, P, D)
    pos_sq = jnp.sum(pos * pos, axis=-1)                # (tb, P)
    pos_dot = jnp.sum(pos * xb, axis=-1)                # (tb, P)
    # |dot| / (||x|| * ||v||)  ==  |dot| * rsqrt(x_sq * v_sq)
    pos_scores = jnp.abs(pos_dot) * jax.lax.rsqrt(x_sq * pos_sq)
    pos_labels = alpha_f * psem_ref[...].astype(jnp.float32) + one_minus_alpha
    dp = pos_scores - pos_labels
    pos_out[...] = pos_scores.astype(pos_out.dtype)

    # ---- negative path ----
    neg = neg_ref[...].astype(jnp.float32)             # (tb, N, D)
    neg_sq = jnp.sum(neg * neg, axis=-1)                # (tb, N)
    neg_dot = jnp.sum(neg * xb, axis=-1)                # (tb, N)
    neg_scores = jnp.abs(neg_dot) * jax.lax.rsqrt(x_sq * neg_sq)
    neg_labels = alpha_f * nsem_ref[...].astype(jnp.float32)
    dn = neg_scores - neg_labels
    neg_out[...] = neg_scores.astype(neg_out.dtype)

    # Per-row partial losses; the final scalar reduction happens outside the
    # kernel so every grid axis stays "parallel" (no serial accumulator).
    loss_out[...] = (jnp.sum(dp * dp, axis=-1, keepdims=True) +
                     jnp.sum(dn * dn, axis=-1, keepdims=True))


def _choose_batch_tile(B, P, N, D, elem_bytes=4, budget_bytes=8 * 1024 * 1024):
    """Largest batch tile tb (multiple of 8 dividing B, or B itself) whose
    double-buffered working set fits well under the v7x-safe VMEM budget."""
    candidates = sorted({t for t in range(8, B + 1, 8) if B % t == 0} | {B})
    per_row = elem_bytes * ((P + N + 1) * D + 3 * (P + N) + 1)
    best = None
    for t in candidates:
        if 2 * t * per_row <= budget_bytes:   # x2 for double buffering
            best = t
    return best if best is not None else min(candidates)


def cross_match_loss(input_vector, positive_vectors, negative_vectors,
                     positive_semantic_match_scores,
                     negative_semantic_match_scores, alpha=0.0):
    """Pallas implementation of CrossMatchLoss.forward (full-input path)."""
    B, D = input_vector.shape
    P = positive_vectors.shape[1]
    N = negative_vectors.shape[1]
    assert positive_vectors.shape == (B, P, D)
    assert negative_vectors.shape == (B, N, D)

    tb = _choose_batch_tile(B, P, N, D)
    grid = (B // tb,)
    score_dtype = input_vector.dtype

    kernel = functools.partial(_cross_match_kernel, alpha=float(alpha))

    pos_scores, neg_scores, row_loss = pl.pallas_call(
        kernel,
        grid=grid,
        out_shape=(
            jax.ShapeDtypeStruct((B, P), score_dtype),
            jax.ShapeDtypeStruct((B, N), score_dtype),
            jax.ShapeDtypeStruct((B, 1), jnp.float32),
        ),
        in_specs=[
            pl.BlockSpec((tb, D), lambda b: (b, 0)),        # input_vector
            pl.BlockSpec((tb, P, D), lambda b: (b, 0, 0)),  # positive_vectors
            pl.BlockSpec((tb, N, D), lambda b: (b, 0, 0)),  # negative_vectors
            pl.BlockSpec((tb, P), lambda b: (b, 0)),        # positive sem scores
            pl.BlockSpec((tb, N), lambda b: (b, 0)),        # negative sem scores
        ],
        out_specs=(
            pl.BlockSpec((tb, P), lambda b: (b, 0)),
            pl.BlockSpec((tb, N), lambda b: (b, 0)),
            pl.BlockSpec((tb, 1), lambda b: (b, 0)),
        ),
        compiler_params=pltpu.CompilerParams(
            dimension_semantics=("parallel",),
            vmem_limit_bytes=32 * 1024 * 1024,
        ),
    )(input_vector, positive_vectors, negative_vectors,
      positive_semantic_match_scores, negative_semantic_match_scores)

    loss = jnp.sum(row_loss)

    return {
        "loss": loss,
        "scores": {"positive": pos_scores, "negative": neg_scores},
        "input_vector": input_vector,
        "positive_vectors": positive_vectors,
        "negative_vectors": negative_vectors,
        "semantic_match_factor": alpha,
    }


def _reference(x, pos, neg, psem, nsem, alpha):
    x_norm = jnp.linalg.norm(x, axis=-1, keepdims=True)
    pos_norm = jnp.linalg.norm(pos, axis=-1)
    neg_norm = jnp.linalg.norm(neg, axis=-1)
    pos_scores = jnp.abs(jnp.einsum("bd,bpd->bp", x, pos)) / (x_norm * pos_norm)
    neg_scores = jnp.abs(jnp.einsum("bd,bnd->bn", x, neg)) / (x_norm * neg_norm)
    pos_labels = alpha * psem + (1 - alpha) * jnp.ones_like(pos_scores)
    neg_labels = alpha * nsem + (1 - alpha) * jnp.zeros_like(neg_scores)
    loss = (jnp.sum((pos_scores - pos_labels) ** 2) +
            jnp.sum((neg_scores - neg_labels) ** 2))
    return loss, pos_scores, neg_scores


if __name__ == "__main__":
    B, P, N, D = 2, 8, 8, 32
    alpha = 0.3

    key = jax.random.PRNGKey(0)
    k1, k2, k3, k4, k5 = jax.random.split(key, 5)
    x = jax.random.normal(k1, (B, D), dtype=jnp.float32)
    pos = jax.random.normal(k2, (B, P, D), dtype=jnp.float32)
    neg = jax.random.normal(k3, (B, N, D), dtype=jnp.float32)
    psem = jax.random.uniform(k4, (B, P), dtype=jnp.float32)
    nsem = jax.random.uniform(k5, (B, N), dtype=jnp.float32)

    out = cross_match_loss(x, pos, neg, psem, nsem, alpha=alpha)
    jax.block_until_ready(out["loss"])

    ref_loss, ref_pos, ref_neg = _reference(x, pos, neg, psem, nsem, alpha)
    assert jnp.allclose(out["loss"], ref_loss, rtol=1e-5, atol=1e-5)
    assert jnp.allclose(out["scores"]["positive"], ref_pos, rtol=1e-5, atol=1e-5)
    assert jnp.allclose(out["scores"]["negative"], ref_neg, rtol=1e-5, atol=1e-5)

    print("KERNEL_OK")
</pallas_src>

<mosaic_0001>
module attributes {stable_mosaic.version = 11 : i64} {
  func.func @_cross_match_kernel(%arg0: i32, %arg1: memref<2x32xf32, #tpu.memory_space<vmem>>, %arg2: memref<2x8x32xf32, #tpu.memory_space<vmem>>, %arg3: memref<2x8x32xf32, #tpu.memory_space<vmem>>, %arg4: memref<2x8xf32, #tpu.memory_space<vmem>>, %arg5: memref<2x8xf32, #tpu.memory_space<vmem>>, %arg6: memref<2x8xf32, #tpu.memory_space<vmem>>, %arg7: memref<2x8xf32, #tpu.memory_space<vmem>>, %arg8: memref<2x1xf32, #tpu.memory_space<vmem>>) attributes {dimension_semantics = [#tpu.dimension_semantics<parallel>], iteration_bounds = array<i64: 1>, scalar_prefetch = 0 : i64, scratch_operands = 0 : i64, tpu.core_type = #tpu.core_type<tc>, window_params = [{transform_indices = @transform_0, window_bounds = array<i64: 2, 32>}, {transform_indices = @transform_1, window_bounds = array<i64: 2, 8, 32>}, {transform_indices = @transform_2, window_bounds = array<i64: 2, 8, 32>}, {transform_indices = @transform_3, window_bounds = array<i64: 2, 8>}, {transform_indices = @transform_4, window_bounds = array<i64: 2, 8>}, {transform_indices = @transform_5, window_bounds = array<i64: 2, 8>}, {transform_indices = @transform_6, window_bounds = array<i64: 2, 8>}, {transform_indices = @transform_7, window_bounds = array<i64: 2, 1>}]} {
    %c0 = arith.constant 0 : index
    %c0_0 = arith.constant 0 : index
    %0 = vector.load %arg1[%c0, %c0_0] : memref<2x32xf32, #tpu.memory_space<vmem>>, vector<2x32xf32>
    %1 = arith.mulf %0, %0 : vector<2x32xf32>
    %cst = arith.constant dense<0.000000e+00> : vector<2xf32>
    %2 = vector.multi_reduction <add>, %1, %cst [1] : vector<2x32xf32> to vector<2xf32>
    %3 = vector.shape_cast %2 : vector<2xf32> to vector<2x1xf32>
    %4 = vector.shape_cast %0 : vector<2x32xf32> to vector<2x1x32xf32>
    %c0_1 = arith.constant 0 : index
    %c0_2 = arith.constant 0 : index
    %c0_3 = arith.constant 0 : index
    %5 = vector.load %arg2[%c0_1, %c0_2, %c0_3] : memref<2x8x32xf32, #tpu.memory_space<vmem>>, vector<2x8x32xf32>
    %6 = arith.mulf %5, %5 : vector<2x8x32xf32>
    %cst_4 = arith.constant dense<0.000000e+00> : vector<2x8xf32>
    %7 = vector.multi_reduction <add>, %6, %cst_4 [2] : vector<2x8x32xf32> to vector<2x8xf32>
    %8 = vector.broadcast %4 : vector<2x1x32xf32> to vector<2x8x32xf32>
    %9 = arith.mulf %5, %8 : vector<2x8x32xf32>
    %cst_5 = arith.constant dense<0.000000e+00> : vector<2x8xf32>
    %10 = vector.multi_reduction <add>, %9, %cst_5 [2] : vector<2x8x32xf32> to vector<2x8xf32>
    %11 = math.absf %10 : vector<2x8xf32>
    %12 = vector.broadcast %3 : vector<2x1xf32> to vector<2x8xf32>
    %13 = arith.mulf %12, %7 : vector<2x8xf32>
    %14 = math.rsqrt %13 : vector<2x8xf32>
    %15 = arith.mulf %11, %14 : vector<2x8xf32>
    %c0_6 = arith.constant 0 : index
    %c0_7 = arith.constant 0 : index
    %16 = vector.load %arg4[%c0_6, %c0_7] : memref<2x8xf32, #tpu.memory_space<vmem>>, vector<2x8xf32>
    %cst_8 = arith.constant 3.000000e-01 : f32
    %17 = vector.broadcast %cst_8 : f32 to vector<2x8xf32>
    %18 = arith.mulf %17, %16 : vector<2x8xf32>
    %cst_9 = arith.constant 0.699999988 : f32
    %19 = vector.broadcast %cst_9 : f32 to vector<2x8xf32>
    %20 = arith.addf %18, %19 : vector<2x8xf32>
    %21 = arith.subf %15, %20 : vector<2x8xf32>
    %c0_10 = arith.constant 0 : index
    %c0_11 = arith.constant 0 : index
    %22 = vector.load %arg6[%c0_10, %c0_11] : memref<2x8xf32, #tpu.memory_space<vmem>>, vector<2x8xf32>
    tpu.vector_store %arg6[%c0_10, %c0_11], %15 {strides = array<i32>} : memref<2x8xf32, #tpu.memory_space<vmem>>, vector<2x8xf32>,
    %c0_12 = arith.constant 0 : index
    %c0_13 = arith.constant 0 : index
    %c0_14 = arith.constant 0 : index
    %23 = vector.load %arg3[%c0_12, %c0_13, %c0_14] : memref<2x8x32xf32, #tpu.memory_space<vmem>>, vector<2x8x32xf32>
    %24 = arith.mulf %23, %23 : vector<2x8x32xf32>
    %cst_15 = arith.constant dense<0.000000e+00> : vector<2x8xf32>
    %25 = vector.multi_reduction <add>, %24, %cst_15 [2] : vector<2x8x32xf32> to vector<2x8xf32>
    %26 = vector.broadcast %4 : vector<2x1x32xf32> to vector<2x8x32xf32>
    %27 = arith.mulf %23, %26 : vector<2x8x32xf32>
    %cst_16 = arith.constant dense<0.000000e+00> : vector<2x8xf32>
    %28 = vector.multi_reduction <add>, %27, %cst_16 [2] : vector<2x8x32xf32> to vector<2x8xf32>
    %29 = math.absf %28 : vector<2x8xf32>
    %30 = vector.broadcast %3 : vector<2x1xf32> to vector<2x8xf32>
    %31 = arith.mulf %30, %25 : vector<2x8xf32>
    %32 = math.rsqrt %31 : vector<2x8xf32>
    %33 = arith.mulf %29, %32 : vector<2x8xf32>
    %c0_17 = arith.constant 0 : index
    %c0_18 = arith.constant 0 : index
    %34 = vector.load %arg5[%c0_17, %c0_18] : memref<2x8xf32, #tpu.memory_space<vmem>>, vector<2x8xf32>
    %cst_19 = arith.constant 3.000000e-01 : f32
    %35 = vector.broadcast %cst_19 : f32 to vector<2x8xf32>
    %36 = arith.mulf %35, %34 : vector<2x8xf32>
    %37 = arith.subf %33, %36 : vector<2x8xf32>
    %c0_20 = arith.constant 0 : index
    %c0_21 = arith.constant 0 : index
    %38 = vector.load %arg7[%c0_20, %c0_21] : memref<2x8xf32, #tpu.memory_space<vmem>>, vector<2x8xf32>
    tpu.vector_store %arg7[%c0_20, %c0_21], %33 {strides = array<i32>} : memref<2x8xf32, #tpu.memory_space<vmem>>, vector<2x8xf32>,
    %39 = arith.mulf %21, %21 : vector<2x8xf32>
    %cst_22 = arith.constant dense<0.000000e+00> : vector<2xf32>
    %40 = vector.multi_reduction <add>, %39, %cst_22 [1] : vector<2x8xf32> to vector<2xf32>
    %41 = vector.shape_cast %40 : vector<2xf32> to vector<2x1xf32>
    %42 = arith.mulf %37, %37 : vector<2x8xf32>
    %cst_23 = arith.constant dense<0.000000e+00> : vector<2xf32>
    %43 = vector.multi_reduction <add>, %42, %cst_23 [1] : vector<2x8xf32> to vector<2xf32>
    %44 = vector.shape_cast %43 : vector<2xf32> to vector<2x1xf32>
    %45 = arith.addf %41, %44 : vector<2x1xf32>
    %c0_24 = arith.constant 0 : index
    %c0_25 = arith.constant 0 : index
    %46 = vector.load %arg8[%c0_24, %c0_25] : memref<2x1xf32, #tpu.memory_space<vmem>>, vector<2x1xf32>
    tpu.vector_store %arg8[%c0_24, %c0_25], %45 {strides = array<i32>} : memref<2x1xf32, #tpu.memory_space<vmem>>, vector<2x1xf32>,
    return
  }
  func.func @transform_0(%arg0: i32) -> (i32, i32) {
    %c0_i32 = arith.constant 0 : i32
    %c0_i32_0 = arith.constant 0 : i32
    return %arg0, %c0_i32 : i32, i32
  }
  func.func @transform_1(%arg0: i32) -> (i32, i32, i32) {
    %c0_i32 = arith.constant 0 : i32
    %c0_i32_0 = arith.constant 0 : i32
    %c0_i32_1 = arith.constant 0 : i32
    return %arg0, %c0_i32, %c0_i32_0 : i32, i32, i32
  }
  func.func @transform_2(%arg0: i32) -> (i32, i32, i32) {
    %c0_i32 = arith.constant 0 : i32
    %c0_i32_0 = arith.constant 0 : i32
    %c0_i32_1 = arith.constant 0 : i32
    return %arg0, %c0_i32, %c0_i32_0 : i32, i32, i32
  }
  func.func @transform_3(%arg0: i32) -> (i32, i32) {
    %c0_i32 = arith.constant 0 : i32
    %c0_i32_0 = arith.constant 0 : i32
    return %arg0, %c0_i32 : i32, i32
  }
  func.func @transform_4(%arg0: i32) -> (i32, i32) {
    %c0_i32 = arith.constant 0 : i32
    %c0_i32_0 = arith.constant 0 : i32
    return %arg0, %c0_i32 : i32, i32
  }
  func.func @transform_5(%arg0: i32) -> (i32, i32) {
    %c0_i32 = arith.constant 0 : i32
    %c0_i32_0 = arith.constant 0 : i32
    return %arg0, %c0_i32 : i32, i32
  }
  func.func @transform_6(%arg0: i32) -> (i32, i32) {
    %c0_i32 = arith.constant 0 : i32
    %c0_i32_0 = arith.constant 0 : i32
    return %arg0, %c0_i32 : i32, i32
  }
  func.func @transform_7(%arg0: i32) -> (i32, i32) {
    %c0_i32 = arith.constant 0 : i32
    %c0_i32_0 = arith.constant 0 : i32
    return %arg0, %c0_i32 : i32, i32
  }
}

</mosaic_0001>

<bundles_post_ra>
// kernel: tpu_custom_call.1
= control target key start
LH: loop header
LB: loop body
LE: loop exit
PB: predicated region body
PF: predicated region fallthrough
CT: control target
= control target key end

     0   :  { %13 = vsyncpa [#allocation3], 0  ;;  %s675_s0 = inlined_call_operand.hbm [shape: f32[2,32], index: 0, kind: input, shape index: {}]   ;;  %s676_s1 = inlined_call_operand.hbm [shape: f32[2,8,32], index: 1, kind: input, shape index: {}]   ;;  %s677_s2 = inlined_call_operand.hbm [shape: f32[2,8,32], index: 2, kind: input, shape index: {}]   ;;  %s678_s3 = inlined_call_operand.vmem [shape: f32[2,8], index: 3, kind: input, shape index: {}]   ;;  %s679_s4 = inlined_call_operand.vmem [shape: f32[2,8], index: 4, kind: input, shape index: {}]   ;;  %s680_s5 = inlined_call_operand.hbm [shape: f32[2,8], index: 5, kind: output, shape index: {0}]   ;;  %s681_s6 = inlined_call_operand.hbm [shape: f32[2,8], index: 6, kind: output, shape index: {1}]   ;;  %s682_s7 = inlined_call_operand.vmem [shape: f32[2,1], index: 7, kind: output, shape index: {2}]  }
   0x1   :  { %14 = vsyncpa [#allocation6], 0 }
   0x2   :  { %15 = vsyncpa [#allocation4], 0 }
   0x3   :  { %16 = vsyncpa [#allocation10], 0  ;;  %s511_s24 = smov [#allocation5]   ;;  %s393_s28 = scalar_lea.hbm %s676_s1, 256 }
   0x4   :  { %s32_s25 = sshll.u32 %s511_s24, 4  ;;  %p394_p0 = scmp.ne.s32.totalorder %s676_s1, %s393_s28  ;;  %s33_s25 = int_to_ptr.vmem [resolvable:$true] %s32_s25 }
   0x5   :  { %p397_p1 = scmp.lt.u32.totalorder %s393_s28, %s676_s1 }
   0x7   :  { %p399_p2 = pnand %p397_p1, %p394_p0 }
   0x9   :  { %402 = shalt.err (!%p399_p2)
}
   0xa   :  { %s403_s10 = scalar_lea.vmem %s33_s25, 256  ;;  %p408_p4 = scmp.lt.s32.totalorder %s33_s25, %s33_s25 }
   0xb   :  { %p404_p3 = scmp.ne.s32.totalorder %s33_s25, %s403_s10  ;;  %p409_p5 = scmp.lt.s32.totalorder %s403_s10, %s403_s10 }
   0xd   :  { %p410_p6 = por %p409_p5, %p408_p4 }
   0xf   :  { %p411_p7 = pnand %p410_p6, %p404_p3 }
  0x11   :  { %414 = shalt.err (!%p411_p7)
}
  0x12   :  { %s512_s11 = smov 128   ;;  %s513_s12 = smov 8  }
  0x13   :  { %38 = dma.hbm_to_vmem [thread:$0]  %s676_s1, 256, %s33_s25, [#allocation6], %s512_s11, %s512_s11, %s513_s12  }
  0x14   :  { %s514_s15 = smov [#allocation2]   ;;  %s515_s17 = smov [#allocation7]  }
  0x15   :  { %s23_s16 = sshll.u32 %s514_s15, 4  ;;  %s44_s18 = sshll.u32 %s515_s17, 4  ;;  %s24_s16 = int_to_ptr.vmem [resolvable:$true] %s23_s16  ;;  %s45_s18 = int_to_ptr.vmem [resolvable:$true] %s44_s18 }
  0x16   :  { %s415_s21 = scalar_lea.hbm %s675_s0, 32 }
  0x17   :  { %p416_p8 = scmp.ne.s32.totalorder %s675_s0, %s415_s21  ;;  %p419_p9 = scmp.lt.u32.totalorder %s415_s21, %s675_s0 }
  0x19   :  { %p421_p10 = pnand %p419_p9, %p416_p8 }
  0x1b   :  { %424 = shalt.err (!%p421_p10)
}
  0x1c   :  { %s425_s1 = scalar_lea.vmem %s24_s16, 32  ;;  %p430_p12 = scmp.lt.s32.totalorder %s24_s16, %s24_s16 }
  0x1d   :  { %p426_p11 = scmp.ne.s32.totalorder %s24_s16, %s425_s1  ;;  %p431_p13 = scmp.lt.s32.totalorder %s425_s1, %s425_s1 }
  0x1f   :  { %p432_p0 = por %p431_p13, %p430_p12 }
  0x21   :  { %p433_p1 = pnand %p432_p0, %p426_p11 }
  0x23   :  { %436 = shalt.err (!%p433_p1)
}
  0x24   :  { %26 = dma.hbm_to_vmem [thread:$0]  %s675_s0, 32, %s24_s16, [#allocation3]  }
  0x25   :  { %s437_s30 = scalar_lea.hbm %s677_s2, 256 }
  0x26   :  { %p438_p2 = scmp.ne.s32.totalorder %s677_s2, %s437_s30  ;;  %p441_p3 = scmp.lt.u32.totalorder %s437_s30, %s677_s2 }
  0x28   :  { %p443_p4 = pnand %p441_p3, %p438_p2 }
  0x2a   :  { %446 = shalt.err (!%p443_p4)
}
  0x2b   :  { %s447_s14 = scalar_lea.vmem %s45_s18, 256  ;;  %p452_p6 = scmp.lt.s32.totalorder %s45_s18, %s45_s18 }
  0x2c   :  { %p448_p5 = scmp.ne.s32.totalorder %s45_s18, %s447_s14  ;;  %p453_p7 = scmp.lt.s32.totalorder %s447_s14, %s447_s14 }
  0x2e   :  { %p454_p8 = por %p453_p7, %p452_p6 }
  0x30   :  { %p455_p9 = pnand %p454_p8, %p448_p5 }
  0x32   :  { %458 = shalt.err (!%p455_p9)
}
  0x33   :  { %50 = dma.hbm_to_vmem [thread:$0]  %s677_s2, 256, %s45_s18, [#allocation6], %s512_s11, %s512_s11, %s513_s12  }
  0x34   :  { %503 = dma.done.wait [#allocation3], 32  }
  0x35   :  { %504 = vsyncadd [#allocation3], 4294967264 }
  0x36   :  { %505 = dma.done.wait [#allocation6], 512  }
  0x37   :  { %506 = vsyncadd [#allocation6], 4294966784  ;;  %v74_v0 = vlaneseq  ;;  %v516_v1 = vmov 1966171168   ;;  %v93_v8 = vld [vmem:[#allocation5] sm:$0xff]  ;;  %vm97_vm0 = vcmask 261120  }
  0x38   :  { %v72_v2 = vunpack.c.l.s4 %v516_v1  ;;  %v202_v9 = vld [vmem:[#allocation7] sm:$0xff]  ;;  %v94_v10 = vld [vmem:[#allocation5 + $0x8] sm:$0xff]  ;;  %v95_v11 = vmul.f32 %v93_v8, %v93_v8  ;;  %v203_v14 = vld [vmem:[#allocation7 + $0x8] sm:$0xff]  ;;  %vm66_vm1 = vcmask 254976   ;;  %vm136_vm2 = vcmask 1041409   ;;  %s519_s17 = smov [#allocation9]  }
  0x39   :  { %v75_v3 = vshrl.u32 %v74_v0, 7  ;;  %v127_v4 = vand.u32 127, %v74_v0  ;;  %v204_v12 = vmul.f32 %v202_v9, %v202_v9  ;;  %v96_v13 = vmul.f32 %v94_v10, %v94_v10  ;;  %v64_v15 = vld [vmem:[#allocation2] sm:$0x3]  ;;  %s360_s18 = sshll.u32 %s519_s17, 4  ;;  %s361_s18 = int_to_ptr.vmem [resolvable:$true] %s360_s18 }
  0x3a   :  { %v73_v5 = vunpack.c.0.s8 %v72_v2  ;;  %v205_v16 = vmul.f32 %v203_v14, %v203_v14  ;;  %v98_v18 = vsel %vm97_vm0, %v95_v11, 0.0  ;;  %v65_v23 = vmul.f32 %v64_v15, %v64_v15  ;;  %v160_v28 = vld [vmem:[%s678_s3] sm:$0x3] }
  0x3b   :  { %v602_v6 = vsub.s32 %v127_v4, %v75_v3  ;;  %v206_v19 = vsel %vm97_vm0, %v204_v12, 0.0  ;;  %99 = vadd.xlane.f32.xlu0 %v98_v18  ;;  %v101_v21 = vsel %vm97_vm0, %v96_v13, 0.0  ;;  %v608_v24 = vsub.s32 0, %v75_v3  ;;  %v255_v58 = vld [vmem:[%s679_s4] sm:$0x3]  ;;  %s518_s4 = smov [#allocation8]  }
  0x3c   :  { %v76_v7 = vsub.s32 %v73_v5, %v75_v3  ;;  %207 = vadd.xlane.f32.xlu1 %v206_v19  ;;  %v209_v22 = vsel %vm97_vm0, %v205_v16, 0.0  ;;  %v67_v27 = vsel %vm66_vm1, %v65_v23, 0.0  ;;  %v161_v30 = vmul.f32 0.3, %v160_v28  ;;  %s350_s16 = sshll.u32 %s518_s4, 4  ;;  %s351_s16 = int_to_ptr.vmem [resolvable:$true] %s350_s16 }
  0x3d   :  { %v151_v36 = vsub.s32 1, %v75_v3  ;;  %v517_v57 = vmov 0   ;;  %v256_v59 = vmul.f32 0.3, %v255_v58  ;;  %vm200_vm3 = vcmask 58368   ;;  %s459_s19 = scalar_lea.vmem %s351_s16, 32  ;;  %p464_p11 = scmp.lt.s32.totalorder %s351_s16, %s351_s16 }
  0x3e   :  { %v77_v17 = vrot.slane %v64_v15, %v76_v7  ;;  %v162_v33 = vadd.f32 0.7, %v161_v30  ;;  %388 = vset.pattern.permute.xlu0 %v517_v57  ;;  %387 = vset.pattern.permute.xlu1 %v517_v57  ;;  %p460_p10 = scmp.ne.s32.totalorder %s351_s16, %s459_s19  ;;  %p465_p12 = scmp.lt.s32.totalorder %s459_s19, %s459_s19 }
  0x3f   :  { %102 = vadd.xlane.f32.xlu0 %v101_v21  ;;  %v268_v0 = vrot.slane %v256_v59, %v151_v36  ;;  %v261_v3 = vrot.slane %v256_v59, %v608_v24 }
  0x40   :  { %v78_v20 = vcombine.high %v77_v17, %v77_v17  ;;  %210 = vadd.xlane.f32.xlu1 %v209_v22  ;;  %v167_v35 = vrot.slane %v162_v33, %v608_v24  ;;  %v174_v37 = vrot.slane %v162_v33, %v151_v36  ;;  %v85_v38 = vrot.slane %v77_v17, %v76_v7  ;;  %p466_p13 = por %p465_p12, %p464_p11 }
  0x42   :  { %v92_v25 = vrot.slane %v78_v20, %v76_v7  ;;  %v107_v39 = vrot.slane %v85_v38, %v608_v24  ;;  %p467_p0 = pnand %p466_p13, %p460_p10 }
  0x43   :  { %68 = vadd.xlane.f32.xlu0 %v67_v27 }
  0x44   :  { %v111_v26 = vrot.slane %v92_v25, %v608_v24  ;;  %v114_v40 = vmul.f32 %v107_v39, %v93_v8  ;;  %v212_v42 = vmul.f32 %v202_v9, %v107_v39 }
  0x46   :  { %v115_v29 = vmul.f32 %v111_v26, %v94_v10  ;;  %v213_v32 = vmul.f32 %v203_v14, %v111_v26  ;;  %v116_v41 = vsel %vm97_vm0, %v114_v40, 0.0  ;;  %v214_v43 = vsel %vm97_vm0, %v212_v42, 0.0 }
  0x48   :  { %v119_v31 = vsel %vm97_vm0, %v115_v29, 0.0  ;;  %v217_v34 = vsel %vm97_vm0, %v213_v32, 0.0 }
  0x49   :  { %120 = vadd.xlane.f32.xlu0 %v119_v31 }
  0x4d   :  { %218 = vadd.xlane.f32.xlu0 %v217_v34 }
  0x51   :  { %169 = vbcast.lane.b32.xlu1 %v167_v35, 256 }
  0x63   :  { %176 = vbcast.lane.b32.xlu0 %v174_v37, 256 }
  0x75   :  { %117 = vadd.xlane.f32.xlu1 %v116_v41 }
  0x79   :  { %215 = vadd.xlane.f32.xlu1 %v214_v43 }
  0xc8   :  { %v100_v44 = vpop.xlane.xlu0 %99 }
  0xc9   :  { %v208_v45 = vpop.xlane.xlu1 %207  ;;  %v131_v49 = vrot.slane %v100_v44, %v602_v6 }
  0xca   :  { %v227_v46 = vrot.slane %v208_v45, %v602_v6 }
  0xcc   :  { %v103_v47 = vpop.xlane.xlu0 %102 }
  0xcd   :  { %v211_v48 = vpop.xlane.xlu1 %210  ;;  %v135_v50 = vrot.slane %v103_v47, %v602_v6 }
  0xce   :  { %v231_v51 = vrot.slane %v211_v48, %v602_v6 }
  0xcf   :  { %v137_v52 = vsel %vm136_vm2, %v135_v50, %v131_v49 }
  0xd0   :  { %v232_v53 = vsel %vm136_vm2, %v231_v51, %v227_v46  ;;  %v69_v54 = vpop.xlane.xlu0 %68 }
  0xd1   :  { %v139_v55 = vmul.f32 %v137_v52, %v69_v54  ;;  %v234_v56 = vmul.f32 %v232_v53, %v69_v54  ;;  %v170_v5 = vpop.permute.xlu1 %169 }
  0xd3   :  { %389 = vrsqrt.f32 %v139_v55 }
  0xd4   :  { %391 = vrsqrt.f32 %v234_v56 }
  0xd6   :  { %v121_v4 = vpop.xlane.xlu0 %120 }
  0xd7   :  { %v123_v11 = vand.u32 2147483647, %v121_v4 }
  0xda   :  { %v219_v8 = vpop.xlane.xlu0 %218 }
  0xdb   :  { %v221_v23 = vand.u32 2147483647, %v219_v8 }
  0xdd   :  { %v390_v60 = vpop.eup %389 }
  0xde   :  { %v152_v61 = vrot.slane %v390_v60, %v151_v36  ;;  %v145_v62 = vrot.slane %v390_v60, %v608_v24  ;;  %v392_v63 = vpop.eup %391  ;;  %v177_v10 = vpop.permute.xlu0 %176 }
  0xdf   :  { %v240_v1 = vrot.slane %v392_v63, %v608_v24  ;;  %v247_v2 = vrot.slane %v392_v63, %v151_v36 }
  0xe0   :  { %154 = vbcast.lane.b32.xlu0 %v152_v61, 256  ;;  %147 = vbcast.lane.b32.xlu1 %v145_v62, 256 }
  0xe4   :  { %242 = vbcast.lane.b32.xlu1 %v240_v1, 256  ;;  %270 = vbcast.lane.b32.xlu0 %v268_v0, 256 }
  0xe8   :  { %249 = vbcast.lane.b32.xlu1 %v247_v2, 256 }
  0xec   :  { %263 = vbcast.lane.b32.xlu1 %v261_v3, 256 }
 0x102   :  { %v118_v7 = vpop.xlane.xlu1 %117 }
 0x103   :  { %v122_v12 = vand.u32 2147483647, %v118_v7 }
 0x106   :  { %v216_v9 = vpop.xlane.xlu1 %215 }
 0x107   :  { %v220_v24 = vand.u32 2147483647, %v216_v9 }
 0x152   :  { %v148_v13 = vpop.permute.xlu1 %147  ;;  %v155_v14 = vpop.permute.xlu0 %154 }
 0x153   :  { %v158_v15 = vmul.f32 %v148_v13, %v122_v12  ;;  %v159_v16 = vmul.f32 %v155_v14, %v123_v11 }
 0x155   :  { %v180_v17 = vsub.f32 %v158_v15, %v170_v5  ;;  %v181_v18 = vsub.f32 %v159_v16, %v177_v10 }
 0x156   :  { %v243_v19 = vpop.permute.xlu1 %242  ;;  %v271_v27 = vpop.permute.xlu0 %270 }
 0x157   :  { %v295_v20 = vmul.f32 %v180_v17, %v180_v17  ;;  %v296_v21 = vmul.f32 %v181_v18, %v181_v18  ;;  %v253_v25 = vmul.f32 %v243_v19, %v220_v24 }
 0x159   :  { %300 = vperm.xlu1 %387, %v295_v20   ;;  %303 = vperm.xlu0 %388, %v296_v21  }
 0x15a   :  { %v250_v22 = vpop.permute.xlu1 %249 }
 0x15b   :  { %v254_v26 = vmul.f32 %v250_v22, %v221_v23 }
 0x15d   :  { %185 = vperm.xlu0 %388, %v158_v15   ;;  %v275_v30 = vsub.f32 %v254_v26, %v271_v27 }
 0x15e   :  { %v264_v28 = vpop.permute.xlu1 %263 }
 0x15f   :  { %v274_v29 = vsub.f32 %v253_v25, %v264_v28  ;;  %v319_v32 = vmul.f32 %v275_v30, %v275_v30 }
 0x161   :  { %v318_v31 = vmul.f32 %v274_v29, %v274_v29  ;;  %279 = vperm.xlu0 %388, %v253_v25  }
 0x163   :  { %323 = vperm.xlu1 %387, %v318_v31  }
 0x167   :  { %326 = vperm.xlu1 %387, %v319_v32  }
 0x16b   :  { %188 = vperm.xlu1 %387, %v159_v16  }
 0x16f   :  { %282 = vperm.xlu1 %387, %v254_v26  }
 0x1d8   :  { %v301_v33 = vpop.permute.xlu1 %300  ;;  %v304_v34 = vpop.permute.xlu0 %303 }
 0x1d9   :  { %v308_v35 = vrot.slane %v301_v33, %v602_v6  ;;  %v312_v36 = vrot.slane %v304_v34, %v602_v6 }
 0x1db   :  { %v313_v37 = vsel %vm136_vm2, %v312_v36, %v308_v35 }
 0x1dc   :  { %v315_v38 = vsel %vm200_vm3, %v313_v37, 0.0  ;;  %v186_v40 = vpop.permute.xlu0 %185 }
 0x1dd   :  { %316 = vadd.xlane.f32.xlu0 %v315_v38  ;;  %v193_v47 = vrot.slane %v186_v40, %v602_v6 }
 0x1e0   :  { %v280_v49 = vpop.permute.xlu0 %279 }
 0x1e1   :  { %v287_v52 = vrot.slane %v280_v49, %v602_v6 }
 0x1e2   :  { %v324_v39 = vpop.permute.xlu1 %323 }
 0x1e3   :  { %v331_v42 = vrot.slane %v324_v39, %v602_v6 }
 0x1e6   :  { %v327_v41 = vpop.permute.xlu1 %326 }
 0x1e7   :  { %v335_v43 = vrot.slane %v327_v41, %v602_v6 }
 0x1e9   :  { %v336_v44 = vsel %vm136_vm2, %v335_v43, %v331_v42 }
 0x1ea   :  { %v189_v45 = vpop.permute.xlu1 %188  ;;  %v338_v46 = vsel %vm200_vm3, %v336_v44, 0.0 }
 0x1eb   :  { %v197_v48 = vrot.slane %v189_v45, %v602_v6  ;;  %339 = vadd.xlane.f32.xlu1 %v338_v46 }
 0x1ed   :  { %v198_v50 = vsel %vm136_vm2, %v197_v48, %v193_v47 }
 0x1ee   :  { %v283_v51 = vpop.permute.xlu1 %282  ;;  %201 = vst.msk [vmem:[#allocation8] sm:$0x3] %vm200_vm3, %v198_v50 }
 0x1ef   :  { %v291_v53 = vrot.slane %v283_v51, %v602_v6 }
 0x1f1   :  { %v292_v54 = vsel %vm136_vm2, %v291_v53, %v287_v52 }
 0x1f2   :  { %294 = vst.msk [vmem:[#allocation9] sm:$0x3] %vm200_vm3, %v292_v54 }
 0x1f3   :  { %470 = shalt.err (!%p467_p0)
}
 0x1f4   :  { %s471_s22 = scalar_lea.hbm %s680_s5, 32 }
 0x1f5   :  { %p472_p1 = scmp.ne.s32.totalorder %s680_s5, %s471_s22  ;;  %p475_p2 = scmp.lt.u32.totalorder %s471_s22, %s680_s5 }
 0x1f7   :  { %p477_p3 = pnand %p475_p2, %p472_p1 }
 0x1f9   :  { %480 = shalt.err (!%p477_p3)
}
 0x1fa   :  { %353 = dma.vmem_to_hbm [thread:$0]  %s351_s16, 32, %s680_s5, [#allocation4]  }
 0x1fb   :  { %s481_s28 = scalar_lea.vmem %s361_s18, 32  ;;  %p486_p5 = scmp.lt.s32.totalorder %s361_s18, %s361_s18 }
 0x1fc   :  { %p482_p4 = scmp.ne.s32.totalorder %s361_s18, %s481_s28  ;;  %p487_p6 = scmp.lt.s32.totalorder %s481_s28, %s481_s28 }
 0x1fe   :  { %p488_p7 = por %p487_p6, %p486_p5 }
 0x200   :  { %p489_p8 = pnand %p488_p7, %p482_p4 }
 0x202   :  { %492 = shalt.err (!%p489_p8)
}
 0x203   :  { %s493_s8 = scalar_lea.hbm %s681_s6, 32 }
 0x204   :  { %p494_p9 = scmp.ne.s32.totalorder %s681_s6, %s493_s8  ;;  %p497_p10 = scmp.lt.u32.totalorder %s493_s8, %s681_s6 }
 0x206   :  { %p499_p11 = pnand %p497_p10, %p494_p9 }
 0x208   :  { %502 = shalt.err (!%p499_p11)
}
 0x209   :  { %363 = dma.vmem_to_hbm [thread:$0]  %s361_s18, 32, %s681_s6, [#allocation10]   ;;  %vm342_vm4 = vcmask 1024  }
 0x26a   :  { %v317_v6 = vpop.xlane.xlu0 %316 }
 0x278   :  { %v340_v55 = vpop.xlane.xlu1 %339 }
 0x279   :  { %v341_v56 = vadd.f32 %v340_v55, %v317_v6 }
 0x27b   :  { %343 = vst.msk [vmem:[%s682_s7] sm:$0x3] %vm342_vm4, %v341_v56 }
 0x27c   :  { %507 = dma.done.wait [#allocation4], 32  }
 0x27d   :  { %508 = vsyncadd [#allocation4], 4294967264 }
 0x27e   :  { %509 = dma.done.wait [#allocation10], 32  }
 0x27f   :  { %510 = vsyncadd [#allocation10], 4294967264 }
 0x280   :  { %374 = vsyncpa [#allocation3], 1 }
 0x281   :  { %375 = vsyncpa [#allocation6], 1 }
 0x282   :  { %376 = vsyncpa [#allocation4], 1 }
 0x283   :  { %377 = vsyncpa [#allocation10], 1 }

</bundles_post_ra>
